<compile_context>
chip_gen: v5e
topology: v5e:2x2
jax: 0.10.0
libtpu: 0.0.40
codegen_flags: <defaults>
</compile_context>

<pallas_src>
import functools

import jax
import jax.numpy as jnp
from jax.experimental import pallas as pl
from jax.experimental.pallas import tpu as pltpu

EPS = 1e-5


def residual_block_kernel(x_ref, masks_ref,
                          w1_ref, g1_ref, bt1_ref,
                          w2_ref, g2_ref, bt2_ref,
                          o_ref, *, inv_count):
    """x_ref:     (C, NLp) f32 -- input, (N*L) flattened onto the lane axis, zero padded.
    masks_ref: (3, NLp) f32 -- row 0: l-1 tap valid, row 1: l+1 tap valid,
                               row 2: real (non-padded) column.
    w*_ref:    (C, 3C) packed conv weights; g*/bt*: (C, 1) BN gamma/beta.
    """
    x = x_ref[...]                                   # (C, NLp) f32
    c, nlp = x.shape

    # Hoisted sublane broadcasts of the compact mask rows (JAX does not CSE
    # broadcast_in_dim, so do it once and reuse in both convs).
    masks = masks_ref[...]                           # (3, NLp)
    mm = jnp.broadcast_to(masks[0:1, :], (c, nlp))   # l-1 tap mask
    mp = jnp.broadcast_to(masks[1:2, :], (c, nlp))   # l+1 tap mask
    mv = jnp.broadcast_to(masks[2:3, :], (c, nlp))   # valid-column mask

    def conv(h, w_ref):
        # Shifted taps via XLU roll + seam masks (the masks also realize the
        # zero "same" padding at per-sample boundaries and at padded columns).
        t_m1 = pltpu.roll(h, shift=1, axis=1) * mm          # h[l-1]
        t_p1 = pltpu.roll(h, shift=nlp - 1, axis=1) * mp    # h[l+1]
        taps = jnp.concatenate([t_m1, h, t_p1], axis=0)     # (3C, NLp), tile-aligned for C%8==0
        # Single MXU matmul, K = 3*Cin.  Conv bias omitted (cancelled by BN).
        return jnp.dot(w_ref[...], taps, preferred_element_type=jnp.float32)

    def bn(h, g_ref, b_ref):
        # One-pass stats; padded columns of h are exactly zero by construction,
        # so dividing by the real element count is exact.
        mean = jnp.sum(h, axis=1, keepdims=True) * inv_count       # (C, 1)
        ex2 = jnp.sum(h * h, axis=1, keepdims=True) * inv_count    # (C, 1)
        var = jnp.maximum(ex2 - mean * mean, 0.0)
        a = g_ref[...] * jax.lax.rsqrt(var + EPS)                  # per-channel scale
        b = b_ref[...] - a * mean                                  # per-channel shift
        return a * h + b

    h = conv(x, w1_ref)
    h = jnp.maximum(bn(h, g1_ref, bt1_ref), 0.0) * mv   # ReLU; re-zero padded columns
    h = conv(h, w2_ref)
    h = bn(h, g2_ref, bt2_ref) + x                      # residual (downsample=None)
    o_ref[...] = jnp.maximum(h, 0.0)                    # final ReLU


def residual_block_1d(x_ncl, params):
    """x_ncl: (N, C, L) float32.  params: dict of conv/bn parameters (torch layout)."""
    N, C, L = x_ncl.shape
    NL = N * L
    NLp = ((NL + 127) // 128) * 128                     # lane-dense, multiple of 128

    # (N, C, L) -> (C, N*L), zero-padded on the lane axis.
    # TODO(synk): for production sizes, fuse these layout transposes into the
    # producer/consumer or grid directly over the NCL array.
    x2 = jnp.transpose(x_ncl, (1, 0, 2)).reshape(C, NL)
    x2 = jnp.pad(x2, ((0, 0), (0, NLp - NL)))

    # Conv weights (Cout, Cin, 3) -> packed (Cout, 3*Cin), tap-major blocks
    # [k=0 | k=1 | k=2] matching the stacked-taps order [x[l-1]; x[l]; x[l+1]].
    w1 = jnp.transpose(params["w1"], (0, 2, 1)).reshape(C, 3 * C)
    w2 = jnp.transpose(params["w2"], (0, 2, 1)).reshape(C, 3 * C)
    g1, bt1 = params["g1"].reshape(C, 1), params["bt1"].reshape(C, 1)
    g2, bt2 = params["g2"].reshape(C, 1), params["bt2"].reshape(C, 1)
    # NOTE: conv biases b1/b2 are intentionally NOT passed -- training-mode BN
    # subtracts the per-channel mean, which cancels them exactly.

    # Compact (3, NLp) tap / validity mask slab (tiny; built once host-side).
    col = jnp.arange(NLp)
    valid = col < NL
    mask_m = ((col % L) != 0) & valid           # l-1 tap exists (not sample start)
    mask_p = ((col % L) != (L - 1)) & valid     # l+1 tap exists (not sample end)
    masks = jnp.stack([mask_m, mask_p, valid]).astype(jnp.float32)   # (3, NLp)

    vmem = pl.BlockSpec(memory_space=pltpu.MemorySpace.VMEM)
    kernel = functools.partial(residual_block_kernel, inv_count=1.0 / float(NL))

    out2 = pl.pallas_call(
        kernel,
        out_shape=jax.ShapeDtypeStruct((C, NLp), jnp.float32),
        in_specs=[vmem] * 8,
        out_specs=vmem,
        compiler_params=pltpu.CompilerParams(vmem_limit_bytes=32 * 1024 * 1024),
    )(x2, masks, w1, g1, bt1, w2, g2, bt2)

    return jnp.transpose(out2[:, :NL].reshape(C, N, L), (1, 0, 2))   # back to (N, C, L)


# ---------------------------------------------------------------------------
# Pure-JAX reference (mirrors the PyTorch forward, incl. the conv biases that
# the kernel drops as algebraically dead) for correctness checking.
# ---------------------------------------------------------------------------
def _ref_forward(x, params):
    def conv(x, w, b):
        y = jax.lax.conv_general_dilated(
            x, w, window_strides=(1,), padding=((1, 1),),
            dimension_numbers=("NCH", "OIH", "NCH"))
        return y + b[None, :, None]

    def bn(x, g, bt):
        m = x.mean(axis=(0, 2), keepdims=True)
        v = ((x - m) ** 2).mean(axis=(0, 2), keepdims=True)
        return g[None, :, None] * (x - m) / jnp.sqrt(v + EPS) + bt[None, :, None]

    h = jax.nn.relu(bn(conv(x, params["w1"], params["b1"]), params["g1"], params["bt1"]))
    h = bn(conv(h, params["w2"], params["b2"]), params["g2"], params["bt2"])
    return jax.nn.relu(h + x)


if __name__ == "__main__":
    # Small shapes: batch=2, in_channels=out_channels=8, length=16
    # (stride=1, downsample=None => in_channels must equal out_channels).
    N, C, L = 2, 8, 16
    key = jax.random.PRNGKey(0)
    ks = jax.random.split(key, 8)

    params = {
        "w1": 0.2 * jax.random.normal(ks[0], (C, C, 3), jnp.float32),
        "b1": 0.1 * jax.random.normal(ks[1], (C,), jnp.float32),
        "g1": 1.0 + 0.1 * jax.random.normal(ks[2], (C,), jnp.float32),
        "bt1": 0.1 * jax.random.normal(ks[3], (C,), jnp.float32),
        "w2": 0.2 * jax.random.normal(ks[4], (C, C, 3), jnp.float32),
        "b2": 0.1 * jax.random.normal(ks[5], (C,), jnp.float32),
        "g2": 1.0 + 0.1 * jax.random.normal(ks[6], (C,), jnp.float32),
        "bt2": 0.1 * jax.random.normal(ks[7], (C,), jnp.float32),
    }
    x = jax.random.normal(jax.random.PRNGKey(42), (N, C, L), jnp.float32)

    out = jax.block_until_ready(residual_block_1d(x, params))
    ref = jax.block_until_ready(_ref_forward(x, params))

    assert out.shape == (N, C, L)
    assert jnp.allclose(out, ref, atol=1e-4, rtol=1e-4), \
        f"max abs diff = {jnp.max(jnp.abs(out - ref))}"

    print("KERNEL_OK")
</pallas_src>

<mosaic_0001>
module attributes {stable_mosaic.version = 11 : i64} {
  func.func @residual_block_kernel(%arg0: memref<8x128xf32, #tpu.memory_space<vmem>>, %arg1: memref<3x128xf32, #tpu.memory_space<vmem>>, %arg2: memref<8x24xf32, #tpu.memory_space<vmem>>, %arg3: memref<8x1xf32, #tpu.memory_space<vmem>>, %arg4: memref<8x1xf32, #tpu.memory_space<vmem>>, %arg5: memref<8x24xf32, #tpu.memory_space<vmem>>, %arg6: memref<8x1xf32, #tpu.memory_space<vmem>>, %arg7: memref<8x1xf32, #tpu.memory_space<vmem>>, %arg8: memref<8x128xf32, #tpu.memory_space<vmem>>) attributes {dimension_semantics = [], scalar_prefetch = 0 : i64, scratch_operands = 0 : i64, tpu.core_type = #tpu.core_type<tc>} {
    %c0 = arith.constant 0 : index
    %c0_0 = arith.constant 0 : index
    %0 = vector.load %arg0[%c0, %c0_0] : memref<8x128xf32, #tpu.memory_space<vmem>>, vector<8x128xf32>
    %c0_1 = arith.constant 0 : index
    %c0_2 = arith.constant 0 : index
    %1 = vector.load %arg1[%c0_1, %c0_2] : memref<3x128xf32, #tpu.memory_space<vmem>>, vector<3x128xf32>
    %2 = vector.extract_strided_slice %1 {offsets = [0, 0], sizes = [1, 128], strides = [1, 1]} : vector<3x128xf32> to vector<1x128xf32>
    %3 = vector.shape_cast %2 : vector<1x128xf32> to vector<1x128xf32>
    %4 = vector.broadcast %3 : vector<1x128xf32> to vector<8x128xf32>
    %5 = vector.extract_strided_slice %1 {offsets = [1, 0], sizes = [1, 128], strides = [1, 1]} : vector<3x128xf32> to vector<1x128xf32>
    %6 = vector.shape_cast %5 : vector<1x128xf32> to vector<1x128xf32>
    %7 = vector.broadcast %6 : vector<1x128xf32> to vector<8x128xf32>
    %8 = vector.extract_strided_slice %1 {offsets = [2, 0], sizes = [1, 128], strides = [1, 1]} : vector<3x128xf32> to vector<1x128xf32>
    %9 = vector.shape_cast %8 : vector<1x128xf32> to vector<1x128xf32>
    %10 = vector.broadcast %9 : vector<1x128xf32> to vector<8x128xf32>
    %c1_i32 = arith.constant 1 : i32
    %11 = tpu.dynamic_rotate %0 by %c1_i32 dim 1 : vector<8x128xf32>, i32 -> vector<8x128xf32>
    %12 = arith.mulf %11, %4 : vector<8x128xf32>
    %c127_i32 = arith.constant 127 : i32
    %13 = tpu.dynamic_rotate %0 by %c127_i32 dim 1 : vector<8x128xf32>, i32 -> vector<8x128xf32>
    %14 = arith.mulf %13, %7 : vector<8x128xf32>
    %15 = tpu.concatenate %12, %0, %14 in 0 : vector<8x128xf32>, vector<8x128xf32>, vector<8x128xf32> -> vector<24x128xf32>
    %c0_3 = arith.constant 0 : index
    %c0_4 = arith.constant 0 : index
    %16 = vector.load %arg2[%c0_3, %c0_4] : memref<8x24xf32, #tpu.memory_space<vmem>>, vector<8x24xf32>
    %cst = arith.constant dense<0.000000e+00> : vector<8x128xf32>
    %17 = tpu.matmul %16, %15, %cst {dimension_numbers = #tpu.dot_dimension_numbers<[1], [0], [0], [1], [0, 0, 1, 1], [], []>} : vector<8x24xf32>, vector<24x128xf32>, vector<8x128xf32> -> vector<8x128xf32>
    %cst_5 = arith.constant dense<0.000000e+00> : vector<8xf32>
    %18 = vector.multi_reduction <add>, %17, %cst_5 [1] : vector<8x128xf32> to vector<8xf32>
    %19 = vector.shape_cast %18 : vector<8xf32> to vector<8x1xf32>
    %cst_6 = arith.constant 3.125000e-02 : f32
    %20 = vector.broadcast %cst_6 : f32 to vector<8x1xf32>
    %21 = arith.mulf %19, %20 : vector<8x1xf32>
    %22 = arith.mulf %17, %17 : vector<8x128xf32>
    %cst_7 = arith.constant dense<0.000000e+00> : vector<8xf32>
    %23 = vector.multi_reduction <add>, %22, %cst_7 [1] : vector<8x128xf32> to vector<8xf32>
    %24 = vector.shape_cast %23 : vector<8xf32> to vector<8x1xf32>
    %cst_8 = arith.constant 3.125000e-02 : f32
    %25 = vector.broadcast %cst_8 : f32 to vector<8x1xf32>
    %26 = arith.mulf %24, %25 : vector<8x1xf32>
    %27 = arith.mulf %21, %21 : vector<8x1xf32>
    %28 = arith.subf %26, %27 : vector<8x1xf32>
    %cst_9 = arith.constant 0.000000e+00 : f32
    %29 = vector.broadcast %cst_9 : f32 to vector<8x1xf32>
    %30 = arith.maximumf %28, %29 : vector<8x1xf32>
    %c0_10 = arith.constant 0 : index
    %c0_11 = arith.constant 0 : index
    %31 = vector.load %arg3[%c0_10, %c0_11] : memref<8x1xf32, #tpu.memory_space<vmem>>, vector<8x1xf32>
    %cst_12 = arith.constant 9.99999974E-6 : f32
    %32 = vector.broadcast %cst_12 : f32 to vector<8x1xf32>
    %33 = arith.addf %30, %32 : vector<8x1xf32>
    %34 = math.rsqrt %33 : vector<8x1xf32>
    %35 = arith.mulf %31, %34 : vector<8x1xf32>
    %c0_13 = arith.constant 0 : index
    %c0_14 = arith.constant 0 : index
    %36 = vector.load %arg4[%c0_13, %c0_14] : memref<8x1xf32, #tpu.memory_space<vmem>>, vector<8x1xf32>
    %37 = arith.mulf %35, %21 : vector<8x1xf32>
    %38 = arith.subf %36, %37 : vector<8x1xf32>
    %39 = vector.broadcast %35 : vector<8x1xf32> to vector<8x128xf32>
    %40 = arith.mulf %39, %17 : vector<8x128xf32>
    %41 = vector.broadcast %38 : vector<8x1xf32> to vector<8x128xf32>
    %42 = arith.addf %40, %41 : vector<8x128xf32>
    %cst_15 = arith.constant 0.000000e+00 : f32
    %43 = vector.broadcast %cst_15 : f32 to vector<8x128xf32>
    %44 = arith.maximumf %42, %43 : vector<8x128xf32>
    %45 = arith.mulf %44, %10 : vector<8x128xf32>
    %c1_i32_16 = arith.constant 1 : i32
    %46 = tpu.dynamic_rotate %45 by %c1_i32_16 dim 1 : vector<8x128xf32>, i32 -> vector<8x128xf32>
    %47 = arith.mulf %46, %4 : vector<8x128xf32>
    %c127_i32_17 = arith.constant 127 : i32
    %48 = tpu.dynamic_rotate %45 by %c127_i32_17 dim 1 : vector<8x128xf32>, i32 -> vector<8x128xf32>
    %49 = arith.mulf %48, %7 : vector<8x128xf32>
    %50 = tpu.concatenate %47, %45, %49 in 0 : vector<8x128xf32>, vector<8x128xf32>, vector<8x128xf32> -> vector<24x128xf32>
    %c0_18 = arith.constant 0 : index
    %c0_19 = arith.constant 0 : index
    %51 = vector.load %arg5[%c0_18, %c0_19] : memref<8x24xf32, #tpu.memory_space<vmem>>, vector<8x24xf32>
    %cst_20 = arith.constant dense<0.000000e+00> : vector<8x128xf32>
    %52 = tpu.matmul %51, %50, %cst_20 {dimension_numbers = #tpu.dot_dimension_numbers<[1], [0], [0], [1], [0, 0, 1, 1], [], []>} : vector<8x24xf32>, vector<24x128xf32>, vector<8x128xf32> -> vector<8x128xf32>
    %cst_21 = arith.constant dense<0.000000e+00> : vector<8xf32>
    %53 = vector.multi_reduction <add>, %52, %cst_21 [1] : vector<8x128xf32> to vector<8xf32>
    %54 = vector.shape_cast %53 : vector<8xf32> to vector<8x1xf32>
    %cst_22 = arith.constant 3.125000e-02 : f32
    %55 = vector.broadcast %cst_22 : f32 to vector<8x1xf32>
    %56 = arith.mulf %54, %55 : vector<8x1xf32>
    %57 = arith.mulf %52, %52 : vector<8x128xf32>
    %cst_23 = arith.constant dense<0.000000e+00> : vector<8xf32>
    %58 = vector.multi_reduction <add>, %57, %cst_23 [1] : vector<8x128xf32> to vector<8xf32>
    %59 = vector.shape_cast %58 : vector<8xf32> to vector<8x1xf32>
    %cst_24 = arith.constant 3.125000e-02 : f32
    %60 = vector.broadcast %cst_24 : f32 to vector<8x1xf32>
    %61 = arith.mulf %59, %60 : vector<8x1xf32>
    %62 = arith.mulf %56, %56 : vector<8x1xf32>
    %63 = arith.subf %61, %62 : vector<8x1xf32>
    %cst_25 = arith.constant 0.000000e+00 : f32
    %64 = vector.broadcast %cst_25 : f32 to vector<8x1xf32>
    %65 = arith.maximumf %63, %64 : vector<8x1xf32>
    %c0_26 = arith.constant 0 : index
    %c0_27 = arith.constant 0 : index
    %66 = vector.load %arg6[%c0_26, %c0_27] : memref<8x1xf32, #tpu.memory_space<vmem>>, vector<8x1xf32>
    %cst_28 = arith.constant 9.99999974E-6 : f32
    %67 = vector.broadcast %cst_28 : f32 to vector<8x1xf32>
    %68 = arith.addf %65, %67 : vector<8x1xf32>
    %69 = math.rsqrt %68 : vector<8x1xf32>
    %70 = arith.mulf %66, %69 : vector<8x1xf32>
    %c0_29 = arith.constant 0 : index
    %c0_30 = arith.constant 0 : index
    %71 = vector.load %arg7[%c0_29, %c0_30] : memref<8x1xf32, #tpu.memory_space<vmem>>, vector<8x1xf32>
    %72 = arith.mulf %70, %56 : vector<8x1xf32>
    %73 = arith.subf %71, %72 : vector<8x1xf32>
    %74 = vector.broadcast %70 : vector<8x1xf32> to vector<8x128xf32>
    %75 = arith.mulf %74, %52 : vector<8x128xf32>
    %76 = vector.broadcast %73 : vector<8x1xf32> to vector<8x128xf32>
    %77 = arith.addf %75, %76 : vector<8x128xf32>
    %78 = arith.addf %77, %0 : vector<8x128xf32>
    %cst_31 = arith.constant 0.000000e+00 : f32
    %79 = vector.broadcast %cst_31 : f32 to vector<8x128xf32>
    %80 = arith.maximumf %78, %79 : vector<8x128xf32>
    %c0_32 = arith.constant 0 : index
    %c0_33 = arith.constant 0 : index
    %81 = vector.load %arg8[%c0_32, %c0_33] : memref<8x128xf32, #tpu.memory_space<vmem>>, vector<8x128xf32>
    tpu.vector_store %arg8[%c0_32, %c0_33], %80 {strides = array<i32>} : memref<8x128xf32, #tpu.memory_space<vmem>>, vector<8x128xf32>,
    return
  }
}

</mosaic_0001>

<bundles_post_ra>
// kernel: tpu_custom_call.1
= control target key start
LH: loop header
LB: loop body
LE: loop exit
PB: predicated region body
PF: predicated region fallthrough
CT: control target
= control target key end

     0   :  { %s320_s0 = inlined_call_operand.vmem [shape: f32[8,128], index: 0, kind: input, shape index: {}]   ;;  %s321_s1 = inlined_call_operand.vmem [shape: f32[3,128], index: 1, kind: input, shape index: {}]   ;;  %s322_s2 = inlined_call_operand.vmem [shape: f32[8,24], index: 2, kind: input, shape index: {}]   ;;  %s323_s3 = inlined_call_operand.vmem [shape: f32[8,1], index: 3, kind: input, shape index: {}]   ;;  %s324_s4 = inlined_call_operand.vmem [shape: f32[8,1], index: 4, kind: input, shape index: {}]   ;;  %s325_s5 = inlined_call_operand.vmem [shape: f32[8,24], index: 5, kind: input, shape index: {}]   ;;  %s326_s6 = inlined_call_operand.vmem [shape: f32[8,1], index: 6, kind: input, shape index: {}]   ;;  %s327_s7 = inlined_call_operand.vmem [shape: f32[8,1], index: 7, kind: input, shape index: {}]   ;;  %s328_s8 = inlined_call_operand.hbm [shape: f32[8,128], index: 8, kind: output, shape index: {}]  }
   0x1   :  { %v284_v0 = vld [vmem:[%s320_s0] sm:$0xff] }
   0x2   :  { %13 = vsyncpa [#allocation3], 0  ;;  %s232_s29 = smov 127   ;;  %s233_s30 = smov 1   ;;  %v31_v1 = vld [vmem:[%s321_s1] sm:$0x7] }
   0x3   :  { %38 = vrot.lane.b32.xlu0 %v284_v0, %s232_s29  ;;  %v33_v2 = vperm.slane %v31_v1, 1  ;;  %v32_v5 = vperm.slane %v31_v1, 0  ;;  %v41_v8 = vld [vmem:[%s322_s2] sm:$0xff]  ;;  %vm42_vm0 = vcmask 195584   ;;  %v234_v11 = vmov 0   ;;  %s235_s17 = smov [#allocation2]  }
   0x4   :  { %199 = vset.pattern.permute.xlu2 %v234_v11  ;;  %200 = vset.pattern.permute.xlu1 %v234_v11  ;;  %v76_v25 = vld [vmem:[%s323_s3] sm:$0xff]  ;;  %v34_v35 = vperm.slane %v31_v1, 2  ;;  %s182_s18 = sshll.u32 %s235_s17, 4  ;;  %s184_s20 = sshll.u32 %s328_s8, 4  ;;  %s183_s18 = int_to_ptr.vmem [resolvable:$true] %s182_s18  ;;  %s185_s20 = int_to_ptr.hbm [resolvable:$true] %s184_s20 }
   0x5   :  { %201 = vset.pattern.permute.xlu0 %v234_v11  ;;  %v89_v30 = vld [vmem:[%s324_s4] sm:$0xff] }
   0x6   :  { %v112_v43 = vld [vmem:[%s325_s5] sm:$0xff] }
   0x7   :  { %v146_v59 = vld [vmem:[%s326_s6] sm:$0xff] }
   0x8   :  { %v159_v1 = vld [vmem:[%s327_s7] sm:$0xff] }
   0xb   :  { %35 = vrot.lane.b32.xlu0 %v284_v0, %s233_s30 }
  0x75   :  { %v39_v3 = vpop.permute.xlu0 %38 }
  0x76   :  { %v40_v4 = vmul.f32 %v39_v3, %v33_v2 }
  0x78   :  { %59 = vmatpush.msra.mxu0 %v40_v4 }
  0x7a   :  { %60 = vmatpush.msra.mxu0 %v284_v0 }
  0x7d   :  { %v36_v6 = vpop.permute.xlu0 %35 }
  0x7e   :  { %v37_v7 = vmul.f32 %v36_v6, %v32_v5 }
  0x80   :  { %61 = vmatpush.msra.mxu0 %v37_v7 }
  0x81   :  { %193 = vmatmul.msk.f32.vlgmr.msra.gmra.mxu0 %vm42_vm0, %v41_v8 }
  0xfe   :  { %v63_v9 = vpop.f32.mrf.mxu0 }
  0xff   :  { %66 = vadd.xlane.f32.xlu1 %v63_v9  ;;  %v69_v10 = vmul.f32 %v63_v9, %v63_v9 }
 0x107   :  { %70 = vadd.xlane.f32.xlu1 %v69_v10 }
 0x172   :  { %v67_v12 = vpop.xlane.xlu1 %66 }
 0x173   :  { %v68_v13 = vmul.f32 0.03125, %v67_v12 }
 0x175   :  { %v73_v15 = vmul.f32 %v68_v13, %v68_v13 }
 0x17a   :  { %v71_v14 = vpop.xlane.xlu1 %70 }
 0x17b   :  { %v72_v16 = vmul.f32 0.03125, %v71_v14 }
 0x17d   :  { %v74_v17 = vsub.f32 %v72_v16, %v73_v15 }
 0x17f   :  { %v75_v18 = vmax.f32 %v74_v17, 0.0 }
 0x181   :  { %v77_v19 = vadd.f32 1e-05, %v75_v18 }
 0x183   :  { %202 = vrsqrt.f32 %v77_v19  ;;  %vm84_vm2 = vweird.f32 %v77_v19 }
 0x189   :  { %v203_v20 = vpop.eup %202 }
 0x18a   :  { %v79_v21 = vmul.f32 %v203_v20, %v77_v19  ;;  %vm85_vm1 = vweird.f32 %v203_v20 }
 0x18b   :  { %vm86_vm3 = vmor %vm84_vm2, %vm85_vm1 }
 0x18c   :  { %v80_v22 = vmul.f32 %v203_v20, %v79_v21 }
 0x18e   :  { %v81_v23 = vmul.f32 0.5, %v80_v22 }
 0x190   :  { %v82_v24 = vsub.f32 1.5, %v81_v23 }
 0x192   :  { %v83_v26 = vmul.f32 %v203_v20, %v82_v24 }
 0x194   :  { %v87_v27 = vsel %vm86_vm3, %v203_v20, %v83_v26 }
 0x195   :  { %v88_v28 = vmul.f32 %v87_v27, %v76_v25 }
 0x197   :  { %94 = vperm.xlu2 %199, %v88_v28   ;;  %v90_v29 = vmul.f32 %v88_v28, %v68_v13 }
 0x199   :  { %v91_v31 = vsub.f32 %v89_v30, %v90_v29 }
 0x19f   :  { %100 = vperm.xlu2 %199, %v91_v31  }
 0x1f1   :  { %v95_v32 = vpop.permute.xlu2 %94 }
 0x1f2   :  { %v97_v33 = vmul.f32 %v95_v32, %v63_v9 }
 0x1f9   :  { %v101_v34 = vpop.permute.xlu2 %100 }
 0x1fa   :  { %v103_v36 = vadd.f32 %v101_v34, %v97_v33 }
 0x1fc   :  { %v104_v37 = vmax.f32 %v103_v36, 0.0 }
 0x1fe   :  { %v105_v38 = vmul.f32 %v104_v37, %v34_v35 }
 0x200   :  { %106 = vrot.lane.b32.xlu1 %v105_v38, %s233_s30  ;;  %109 = vrot.lane.b32.xlu0 %v105_v38, %s232_s29 }
 0x272   :  { %v110_v39 = vpop.permute.xlu0 %109  ;;  %v107_v41 = vpop.permute.xlu1 %106 }
 0x273   :  { %v111_v40 = vmul.f32 %v110_v39, %v33_v2  ;;  %v108_v42 = vmul.f32 %v107_v41, %v32_v5 }
 0x275   :  { %129 = vmatpush.msra.mxu1 %v111_v40 }
 0x277   :  { %130 = vmatpush.msra.mxu1 %v105_v38 }
 0x279   :  { %131 = vmatpush.msra.mxu1 %v108_v42 }
 0x27a   :  { %194 = vmatmul.msk.f32.vlgmr.msra.gmra.mxu1 %vm42_vm0, %v112_v43 }
 0x2f7   :  { %v133_v44 = vpop.f32.mrf.mxu1 }
 0x2f8   :  { %136 = vadd.xlane.f32.xlu2 %v133_v44  ;;  %v139_v45 = vmul.f32 %v133_v44, %v133_v44 }
 0x2fa   :  { %140 = vadd.xlane.f32.xlu0 %v139_v45 }
 0x36b   :  { %v137_v46 = vpop.xlane.xlu2 %136 }
 0x36c   :  { %v138_v47 = vmul.f32 0.03125, %v137_v46 }
 0x36d   :  { %v141_v48 = vpop.xlane.xlu0 %140 }
 0x36e   :  { %v143_v49 = vmul.f32 %v138_v47, %v138_v47  ;;  %v142_v50 = vmul.f32 0.03125, %v141_v48 }
 0x370   :  { %v144_v51 = vsub.f32 %v142_v50, %v143_v49 }
 0x372   :  { %v145_v52 = vmax.f32 %v144_v51, 0.0 }
 0x374   :  { %v147_v53 = vadd.f32 1e-05, %v145_v52 }
 0x376   :  { %204 = vrsqrt.f32 %v147_v53  ;;  %vm154_vm5 = vweird.f32 %v147_v53 }
 0x37c   :  { %v205_v54 = vpop.eup %204 }
 0x37d   :  { %v149_v55 = vmul.f32 %v205_v54, %v147_v53  ;;  %vm155_vm4 = vweird.f32 %v205_v54 }
 0x37e   :  { %vm156_vm6 = vmor %vm154_vm5, %vm155_vm4 }
 0x37f   :  { %v150_v56 = vmul.f32 %v205_v54, %v149_v55 }
 0x381   :  { %v151_v57 = vmul.f32 0.5, %v150_v56 }
 0x383   :  { %v152_v58 = vsub.f32 1.5, %v151_v57 }
 0x385   :  { %v153_v60 = vmul.f32 %v205_v54, %v152_v58 }
 0x387   :  { %v157_v61 = vsel %vm156_vm6, %v205_v54, %v153_v60 }
 0x388   :  { %v158_v62 = vmul.f32 %v157_v61, %v146_v59 }
 0x38a   :  { %164 = vperm.xlu1 %200, %v158_v62   ;;  %v160_v63 = vmul.f32 %v158_v62, %v138_v47 }
 0x38c   :  { %v161_v2 = vsub.f32 %v159_v1, %v160_v63 }
 0x392   :  { %170 = vperm.xlu1 %200, %v161_v2  }
 0x3fc   :  { %v165_v3 = vpop.permute.xlu1 %164 }
 0x3fd   :  { %v167_v4 = vmul.f32 %v165_v3, %v133_v44 }
 0x404   :  { %v171_v5 = vpop.permute.xlu1 %170 }
 0x405   :  { %v173_v6 = vadd.f32 %v171_v5, %v167_v4 }
 0x407   :  { %v174_v7 = vadd.f32 %v173_v6, %v284_v0 }
 0x409   :  { %v175_v8 = vmax.f32 %v174_v7, 0.0 }
 0x40b   :  { %176 = vst [vmem:[#allocation2] sm:$0xff] %v175_v8 }
 0x40c   :  { %187 = dma.vmem_to_hbm [thread:$0]  %s183_s18, 128, %s185_s20, [#allocation3]  }
 0x40d   :  { %230 = dma.done.wait [#allocation3], 128  }
 0x40e   :  { %231 = vsyncadd [#allocation3], 4294967168 }
 0x40f   :  { %192 = vsyncpa [#allocation3], 1 }

</bundles_post_ra>
